<compile_context>
chip_gen: v6e
topology: v6e:2x2x1
jax: 0.10.0
libtpu: 0.0.40
codegen_flags: <defaults>
</compile_context>

<pallas_src>
import functools

import jax
import jax.numpy as jnp
from jax.experimental import pallas as pl
from jax.experimental.pallas import tpu as pltpu


# -----------------------------------------------------------------------------
# Single-pass kernel: whole (C, HW) plane(s) resident per grid step.
# -----------------------------------------------------------------------------
def _se_kernel(x_ref, w1t_ref, w2t_ref, o_ref):
    # x_ref : (Bt, C, HW) in the input dtype (NCHW, spatial flattened onto lanes)
    # w1t   : (C, Cr) f32 = fc1.weight.T with the 1/(H*W) mean scale folded in
    # w2t   : (Cr, C) f32 = fc2.weight.T
    x = x_ref[...]                                            # load once

    # Squeeze: spatial sum with f32 accumulation (mean folded into w1t).
    y = jnp.sum(x, axis=2, dtype=jnp.float32)                 # (Bt, C)

    # Excite: tiny MLP, f32 throughout (fully hidden under the DMA).
    h = jnp.dot(y, w1t_ref[...], preferred_element_type=jnp.float32)   # (Bt, Cr)
    h = jnp.maximum(h, 0.0)
    s = jnp.dot(h, w2t_ref[...], preferred_element_type=jnp.float32)   # (Bt, C)
    s = jax.nn.sigmoid(s)

    # Scale: broadcast the per-(batch, channel) gate over the spatial lanes.
    o_ref[...] = x * s.astype(o_ref.dtype)[:, :, None]


# -----------------------------------------------------------------------------
# Two-pass fallback kernels (single plane does not fit VMEM).
# -----------------------------------------------------------------------------
def _se_reduce_kernel(x_ref, sums_ref, *, hw, ts, need_mask):
    # x_ref: (1, C, Ts); sums_ref: (1, 1, C) f32 accumulated over the spatial axis.
    s = pl.program_id(1)

    @pl.when(s == 0)
    def _():
        sums_ref[...] = jnp.zeros_like(sums_ref)

    x = x_ref[...]
    if need_mask:  # mask the ragged spatial tail (OOB input lanes are undefined)
        lane = jax.lax.broadcasted_iota(jnp.int32, x.shape, 2) + s * ts
        x = jnp.where(lane < hw, x, jnp.zeros_like(x))
    sums_ref[...] += jnp.sum(x, axis=2, dtype=jnp.float32)[:, None, :]


def _se_scale_kernel(x_ref, g_ref, o_ref):
    # x_ref: (1, C, Ts); g_ref: (1, C, 1) f32 per-channel gate.
    o_ref[...] = x_ref[...] * g_ref[...].astype(o_ref.dtype)


# -----------------------------------------------------------------------------
# Sizing helpers.
# -----------------------------------------------------------------------------
def _tpu_budget():
    """Return (per-core VMEM bytes, #TensorCores sharing the grid), conservatively."""
    try:
        vmem = int(pltpu.get_tpu_info().vmem_capacity_bytes)
    except Exception:
        vmem = 64 * 2**20  # conservative: assume v7x-class per-core VMEM
    # v7x exposes 64 MiB per TensorCore and has 2 TCs/chip; v5e/v6e: 128 MiB, 1 TC.
    num_cores = 2 if vmem <= 64 * 2**20 else 1
    return vmem, num_cores


def _divisor_at_most(n, k):
    k = max(1, min(n, k))
    while n % k:
        k -= 1
    return k


def _plan_batch_tile(B, per_b_bytes, weight_bytes, vmem_cap, num_cores):
    """Batch-tile size for the single-pass kernel, or None if one (C, HW) plane
    does not fit the VMEM budget (caller uses the two-pass fallback)."""
    headroom = 8 * 2**20
    budget = vmem_cap - headroom - 4 * weight_bytes
    bt_cap = budget // (4 * per_b_bytes)  # x-in + out, double-buffered
    if bt_cap < 1:
        return None

    # Bigger blocks on 128 MiB-VMEM chips (v5e/v6e); smaller on v7x (64 MiB, 2 TCs).
    target = (4 * 2**20) if num_cores > 1 else (12 * 2**20)
    bt = _divisor_at_most(B, min(bt_cap, max(1, target // per_b_bytes)))

    if num_cores > 1 and B > 1:
        # Shape the grid for megacore sharding.  Preference order:
        #   (a) multiple of num_cores with >= 2 steps per core,
        #   (b) multiple of num_cores,
        #   (c) at least num_cores steps.
        def _search(pred):
            cand = bt
            while cand > 1 and not pred(cand):
                cand = _divisor_at_most(B, cand - 1)
            return cand if pred(cand) else None

        for pred in (
            lambda t: (B // t) % num_cores == 0 and (B // t) >= 2 * num_cores,
            lambda t: (B // t) % num_cores == 0,
            lambda t: (B // t) >= num_cores,
        ):
            cand = _search(pred)
            if cand is not None:
                bt = cand
                break
    return bt


# -----------------------------------------------------------------------------
# Public wrapper.
# -----------------------------------------------------------------------------
def se_layer(x_nchw, w1, w2, *, donate_x=False):
    """SELayer forward.

    x_nchw: (B, C, H, W); w1: (C//r, C); w2: (C, C//r)  (PyTorch Linear layout).
    donate_x: if the caller donates x, alias it to the output (halves peak HBM).
    """
    B, C, H, W = x_nchw.shape
    Cr = w1.shape[0]
    HW = H * W
    dtype = x_nchw.dtype
    dtype_bytes = jnp.dtype(dtype).itemsize

    # NCHW kept as-is; reshape to (B, C, H*W) is metadata-only (no HBM traffic).
    x_flat = x_nchw.reshape(B, C, HW)

    # Weight prep (tiny, once): transpose to matmul layout, fold the 1/(H*W)
    # mean scale into fc1, cast to f32.
    w1t = w1.T.astype(jnp.float32) * jnp.float32(1.0 / HW)    # (C, Cr)
    w2t = w2.T.astype(jnp.float32)                            # (Cr, C)

    vmem_cap, num_cores = _tpu_budget()
    per_b = C * HW * dtype_bytes
    weight_bytes = 2 * C * Cr * 4
    bt = _plan_batch_tile(B, per_b, weight_bytes, vmem_cap, num_cores)

    if bt is not None:
        # -------------------- single-pass path --------------------
        grid = (B // bt,)
        block_bytes = bt * per_b
        needed = 4 * block_bytes + 4 * weight_bytes + (2 << 20)
        vmem_limit = int(min(vmem_cap - (4 << 20), max(needed, 16 << 20)))

        out_flat = pl.pallas_call(
            _se_kernel,
            out_shape=jax.ShapeDtypeStruct((B, C, HW), dtype),
            grid_spec=pltpu.PrefetchScalarGridSpec(
                num_scalar_prefetch=0,
                grid=grid,
                in_specs=[
                    pl.BlockSpec((bt, C, HW), lambda b: (b, 0, 0)),
                    pl.BlockSpec((C, Cr), lambda b: (0, 0)),
                    pl.BlockSpec((Cr, C), lambda b: (0, 0)),
                ],
                out_specs=pl.BlockSpec((bt, C, HW), lambda b: (b, 0, 0)),
            ),
            compiler_params=pltpu.CompilerParams(
                dimension_semantics=("parallel",),
                vmem_limit_bytes=vmem_limit,
            ),
            input_output_aliases=({0: 0} if donate_x else {}),
        )(x_flat, w1t, w2t)
        return out_flat.reshape(B, C, H, W)

    # -------------------- two-pass fallback --------------------
    # Pass 1: spatially tiled reduce -> (B, 1, C) f32 sums.
    # (tiny excite MLP on (B, C) in plain JAX — negligible cost)
    # Pass 2: spatially tiled multiply by the per-channel gate.
    headroom = 8 * 2**20
    budget = vmem_cap - headroom
    target = (4 * 2**20) if num_cores > 1 else (12 * 2**20)
    ts = min(min(target, budget // 4) // (C * dtype_bytes), HW)
    ts = (ts // 128) * 128
    if ts < 128:
        raise ValueError(
            f"SELayer Pallas kernel: channel count C={C} is too large for even a "
            f"128-lane spatial tile to fit in VMEM ({vmem_cap} bytes)."
        )
    n_s = pl.cdiv(HW, ts)
    need_mask = (HW % ts) != 0
    block_fb = C * ts * dtype_bytes
    vmem_limit_fb = int(min(vmem_cap - (4 << 20), max(6 * block_fb, 16 << 20)))

    sums = pl.pallas_call(
        functools.partial(_se_reduce_kernel, hw=HW, ts=ts, need_mask=need_mask),
        out_shape=jax.ShapeDtypeStruct((B, 1, C), jnp.float32),
        grid_spec=pltpu.PrefetchScalarGridSpec(
            num_scalar_prefetch=0,
            grid=(B, n_s),
            in_specs=[pl.BlockSpec((1, C, ts), lambda b, s: (b, 0, s))],
            out_specs=pl.BlockSpec((1, 1, C), lambda b, s: (b, 0, 0)),
        ),
        compiler_params=pltpu.CompilerParams(
            dimension_semantics=("parallel", "arbitrary"),
            vmem_limit_bytes=vmem_limit_fb,
        ),
    )(x_flat)

    y = sums.reshape(B, C)                                     # f32 spatial sums
    gate = jax.nn.sigmoid(jnp.maximum(y @ w1t, 0.0) @ w2t)     # (B, C) f32
    gate_t = gate.reshape(B, C, 1)

    out_flat = pl.pallas_call(
        _se_scale_kernel,
        out_shape=jax.ShapeDtypeStruct((B, C, HW), dtype),
        grid_spec=pltpu.PrefetchScalarGridSpec(
            num_scalar_prefetch=0,
            grid=(B, n_s),
            in_specs=[
                pl.BlockSpec((1, C, ts), lambda b, s: (b, 0, s)),
                pl.BlockSpec((1, C, 1), lambda b, s: (b, 0, 0)),
            ],
            out_specs=pl.BlockSpec((1, C, ts), lambda b, s: (b, 0, s)),
        ),
        compiler_params=pltpu.CompilerParams(
            dimension_semantics=("parallel", "parallel"),
            vmem_limit_bytes=vmem_limit_fb,
        ),
        input_output_aliases=({0: 0} if donate_x else {}),
    )(x_flat, gate_t)
    return out_flat.reshape(B, C, H, W)


def _reference(x, w1, w2):
    y = jnp.mean(x, axis=(2, 3))                       # (B, C)
    h = jnp.maximum(y @ w1.T, 0.0)                     # (B, C//r)
    s = jax.nn.sigmoid(h @ w2.T)                       # (B, C)
    return x * s[:, :, None, None]


if __name__ == "__main__":
    B, C, H, W = 2, 32, 16, 16
    reduction = 16
    Cr = C // reduction

    key = jax.random.PRNGKey(0)
    kx, k1, k2 = jax.random.split(key, 3)
    x = jax.random.normal(kx, (B, C, H, W), dtype=jnp.float32)
    # Deterministic synthetic weights (PyTorch Linear layout: (out_features, in_features)).
    w1 = jax.random.normal(k1, (Cr, C), dtype=jnp.float32) * 0.1
    w2 = jax.random.normal(k2, (C, Cr), dtype=jnp.float32) * 0.1

    out = se_layer(x, w1, w2)
    out = jax.block_until_ready(out)

    ref = _reference(x, w1, w2)
    assert out.shape == (B, C, H, W)
    assert jnp.allclose(out, ref, atol=1e-5, rtol=1e-5)

    print("KERNEL_OK")
</pallas_src>

<mosaic_0001>
module attributes {stable_mosaic.version = 11 : i64} {
  func.func @_se_kernel(%arg0: i32, %arg1: memref<1x32x256xf32, #tpu.memory_space<vmem>>, %arg2: memref<32x2xf32, #tpu.memory_space<vmem>>, %arg3: memref<2x32xf32, #tpu.memory_space<vmem>>, %arg4: memref<1x32x256xf32, #tpu.memory_space<vmem>>) attributes {dimension_semantics = [#tpu.dimension_semantics<parallel>], iteration_bounds = array<i64: 2>, scalar_prefetch = 0 : i64, scratch_operands = 0 : i64, tpu.core_type = #tpu.core_type<tc>, window_params = [{transform_indices = @transform_0, window_bounds = array<i64: 1, 32, 256>}, {pipeline_mode = #tpu.pipeline_mode<synchronous>, transform_indices = @transform_1, window_bounds = array<i64: 32, 2>}, {pipeline_mode = #tpu.pipeline_mode<synchronous>, transform_indices = @transform_2, window_bounds = array<i64: 2, 32>}, {transform_indices = @transform_3, window_bounds = array<i64: 1, 32, 256>}]} {
    %c0 = arith.constant 0 : index
    %c0_0 = arith.constant 0 : index
    %c0_1 = arith.constant 0 : index
    %0 = vector.load %arg1[%c0, %c0_0, %c0_1] : memref<1x32x256xf32, #tpu.memory_space<vmem>>, vector<1x32x256xf32>
    %cst = arith.constant dense<0.000000e+00> : vector<1x32xf32>
    %1 = vector.multi_reduction <add>, %0, %cst [2] : vector<1x32x256xf32> to vector<1x32xf32>
    %c0_2 = arith.constant 0 : index
    %c0_3 = arith.constant 0 : index
    %2 = vector.load %arg2[%c0_2, %c0_3] : memref<32x2xf32, #tpu.memory_space<vmem>>, vector<32x2xf32>
    %cst_4 = arith.constant dense<0.000000e+00> : vector<1x2xf32>
    %3 = tpu.matmul %1, %2, %cst_4 {dimension_numbers = #tpu.dot_dimension_numbers<[1], [0], [0], [1], [0, 0, 1, 1], [], []>} : vector<1x32xf32>, vector<32x2xf32>, vector<1x2xf32> -> vector<1x2xf32>
    %cst_5 = arith.constant 0.000000e+00 : f32
    %4 = vector.broadcast %cst_5 : f32 to vector<1x2xf32>
    %5 = arith.maximumf %3, %4 : vector<1x2xf32>
    %c0_6 = arith.constant 0 : index
    %c0_7 = arith.constant 0 : index
    %6 = vector.load %arg3[%c0_6, %c0_7] : memref<2x32xf32, #tpu.memory_space<vmem>>, vector<2x32xf32>
    %cst_8 = arith.constant dense<0.000000e+00> : vector<1x32xf32>
    %7 = tpu.matmul %5, %6, %cst_8 {dimension_numbers = #tpu.dot_dimension_numbers<[1], [0], [0], [1], [0, 0, 1, 1], [], []>} : vector<1x2xf32>, vector<2x32xf32>, vector<1x32xf32> -> vector<1x32xf32>
    %8 = arith.negf %7 : vector<1x32xf32>
    %9 = math.exp %8 : vector<1x32xf32>
    %cst_9 = arith.constant 1.000000e+00 : f32
    %10 = vector.broadcast %cst_9 : f32 to vector<1x32xf32>
    %11 = arith.addf %10, %9 : vector<1x32xf32>
    %12 = arith.divf %10, %11 : vector<1x32xf32>
    %13 = vector.shape_cast %12 : vector<1x32xf32> to vector<1x32x1xf32>
    %14 = vector.broadcast %13 : vector<1x32x1xf32> to vector<1x32x256xf32>
    %15 = arith.mulf %0, %14 : vector<1x32x256xf32>
    %c0_10 = arith.constant 0 : index
    %c0_11 = arith.constant 0 : index
    %c0_12 = arith.constant 0 : index
    %16 = vector.load %arg4[%c0_10, %c0_11, %c0_12] : memref<1x32x256xf32, #tpu.memory_space<vmem>>, vector<1x32x256xf32>
    tpu.vector_store %arg4[%c0_10, %c0_11, %c0_12], %15 {strides = array<i32>} : memref<1x32x256xf32, #tpu.memory_space<vmem>>, vector<1x32x256xf32>,
    return
  }
  func.func @transform_0(%arg0: i32) -> (i32, i32, i32) {
    %c0_i32 = arith.constant 0 : i32
    %c0_i32_0 = arith.constant 0 : i32
    %c0_i32_1 = arith.constant 0 : i32
    return %arg0, %c0_i32, %c0_i32_0 : i32, i32, i32
  }
  func.func @transform_1(%arg0: i32) -> (i32, i32) {
    %c0_i32 = arith.constant 0 : i32
    %c0_i32_0 = arith.constant 0 : i32
    %c0_i32_1 = arith.constant 0 : i32
    return %c0_i32, %c0_i32_0 : i32, i32
  }
  func.func @transform_2(%arg0: i32) -> (i32, i32) {
    %c0_i32 = arith.constant 0 : i32
    %c0_i32_0 = arith.constant 0 : i32
    %c0_i32_1 = arith.constant 0 : i32
    return %c0_i32, %c0_i32_0 : i32, i32
  }
  func.func @transform_3(%arg0: i32) -> (i32, i32, i32) {
    %c0_i32 = arith.constant 0 : i32
    %c0_i32_0 = arith.constant 0 : i32
    %c0_i32_1 = arith.constant 0 : i32
    return %arg0, %c0_i32, %c0_i32_0 : i32, i32, i32
  }
}

</mosaic_0001>

<bundles_post_ra>
// kernel: tpu_custom_call.1
= control target key start
LH: loop header
LB: loop body
LE: loop exit
PB: predicated region body
PF: predicated region fallthrough
CT: control target
= control target key end

     0   :  { %8 = vsyncpa [#allocation3], 0  ;;  %s951_s0 = inlined_call_operand.hbm [shape: f32[2,32,256], index: 0, kind: input, shape index: {}]   ;;  %s952_s1 = inlined_call_operand.vmem [shape: f32[32,2], index: 1, kind: input, shape index: {}]   ;;  %s953_s2 = inlined_call_operand.vmem [shape: f32[2,32], index: 2, kind: input, shape index: {}]   ;;  %s954_s3 = inlined_call_operand.hbm [shape: f32[2,32,256], index: 3, kind: output, shape index: {}]  }
   0x1   :  { %10 = vsyncpa [#allocation3 + $0x1], 0 }
   0x2   :  { %11 = vsyncpa [#allocation4], 0 }
   0x3   :  { %13 = vsyncpa [#allocation4 + $0x1], 0  ;;  %s746_s12 = smov 0   ;;  %s748_s13 = smov 0  }
   0x4   :  { %s750_s14 = smov 0   ;;  %s752_s15 = smov 0  }
   0x5 LB: > { %s767_s16 = sadd.s32 4294967295, %s716_s15   ;;  %s525_s17 = sadd.s32 4294967294, %s716_s15   ;;  %s716_s15 = sphi %s752_s15, %s969_s15   ;;  %s712_s14 = sphi %s750_s14, %s968_s14   ;;  %s708_s13 = sphi %s748_s13, %s967_s13   ;;  %s704_s12 = sphi %s746_s12, %s966_s12  }
   0x6   : > { %s771_s18 = sadd.s32 1, %s716_s15   ;;  %s26_s19 = sadd.s32 1, %s712_s14 }
   0x7   : > { %s23_s20 = ssub.s32 %s716_s15, %s771_s18  ;;  %p33_p0 = scmp.ne.s32.totalorder %s712_s14, %s708_s13 }
   0x8   : > { %p24_p1 = scmp.eq.s32.totalorder %s23_s20, 0  ;;  %p34_p2 = scmp.eq.s32.totalorder %s716_s15, 0 }
   0x9   : > { %p39_p3 = scmp.ne.s32.totalorder %s708_s13, %s704_s12  ;;  %p40_p4 = scmp.eq.s32.totalorder %s767_s16, 0 }
   0xa   : > { %s783_s21 = scalar_select %p24_p1, %s712_s14, %s26_s19  }
   0xb   : > { %p785_p5 = por %p34_p2, %p33_p0  ;;  %p789_p6 = por %p40_p4, %p39_p3 }
   0xc   : > { %p105_p7 = scmp.eq.s32.totalorder %s767_s16, 1  ;;  %p111_p8 = scmp.eq.s32.totalorder %s525_s17, 1 }
   0xd   : > { %s958_s23 = scalar_select %p789_p6, 1, 0 }
   0xe   : > { %p580_p10 = scmp.lt.s32.totalorder %s716_s15, 2  ;;  %p796_p11 = por %p105_p7, %p33_p0 }
   0xf   : > { %p800_p12 = por %p111_p8, %p39_p3  ;;  %s137_s26 = sand.u32 1, %s712_s14  }
  0x10   : > { %s959_s24 = scalar_select %p796_p11, 1, 0 }
  0x11   : > { %s960_s25 = scalar_select %p800_p12, 1, 0 }
  0x12   : > { %s543_s27 = sshll.u32 %s716_s15, 10  ;;  %s528_s28 = sshll.u32 %s137_s26, 6 }
  0x13   : > { %s809_s4 = scalar_lea.hbm %s951_s0, %s543_s27  ;;  %s141_s5 = scalar_lea.vmem [#allocation2], %s528_s28 }
  0x14   : > { %s148_s6 = sshll.u32 %s141_s5, 4  ;;  %p813_p13 = pnand %p580_p10, %p785_p5  ;;  %s817_s6 = int_to_ptr.vmem [resolvable:$true] %s148_s6 }
  0x15   : > { %s819_s8 = scalar_lea.sflag [#allocation3], %s137_s26  ;;  %s624_s9 = scalar_lea.hbm %s809_s4, 1024 }
  0x16   : > { %p625_p0 = scmp.ne.s32.totalorder %s809_s4, %s624_s9  ;;  %p626_p1 = pneg %p813_p13 }
  0x17   : > { %s629_s17 = scalar_lea.hbm %s951_s0, 2048  ;;  %p630_p4 = scmp.lt.s32.totalorder %s809_s4, %s951_s0 }
  0x18   : > { %p627_p2 = pnand %p626_p1, %p625_p0  ;;  %p631_p5 = scmp.lt.s32.totalorder %s629_s17, %s624_s9 }
  0x1a   : > { %p628_p3 = pneg %p627_p2  ;;  %p632_p7 = por %p631_p5, %p630_p4 }
  0x1c   : > { %p633_p8 = pnand %p632_p7, %p628_p3 }
  0x1e   : > { %636 = shalt.err (!%p633_p8)
}
  0x1f   : > { %s637_s22 = scalar_lea.vmem %s817_s6, 1024  ;;  %s718_s26 = smov [#allocation2]  }
  0x20   : > { %p638_p10 = scmp.ne.s32.totalorder %s817_s6, %s637_s22  ;;  %s642_s27 = sshll.u32 %s718_s26, 4  ;;  %s643_s27 = int_to_ptr.vmem [resolvable:$false] %s642_s27 }
  0x21   : > { %s644_s28 = scalar_lea.vmem %s643_s27, 2048  ;;  %p645_p2 = scmp.lt.s32.totalorder %s817_s6, %s643_s27 }
  0x22   : > { %p640_p9 = pnand %p638_p10, %p626_p1  ;;  %p646_p12 = scmp.lt.s32.totalorder %s644_s28, %s637_s22 }
  0x24   : > { %p641_p0 = pneg %p640_p9  ;;  %p647_p11 = por %p646_p12, %p645_p2 }
  0x26   : > { %p648_p6 = pnand %p647_p11, %p641_p0 }
  0x28   : > { %651 = shalt.err (!%p648_p6)
}
  0x29   : > { %s719_s29 = smov 256   ;;  %s720_s30 = smov 16  }
  0x2a   : > { %575 = dma.hbm_to_vmem [thread:$0]  (!%p813_p13), %s809_s4, 1024, %s817_s6, %s819_s8, %s719_s29, %s719_s29, %s720_s30  }
  0x2b   : > { %p531_p9 = scmp.ge.s32.totalorder %s716_s15, 1  ;;  %p156_p1 = scmp.lt.s32.totalorder %s716_s15, 3 }
  0x2d   : > { %p157_p3 = pnand %p531_p9, %p156_p1 }
  0x2e   : > { %s843_s5 = sand.u32 (!%p157_p3), 1, %s708_s13   ;;  %p962_p6 = scmp.ne.s32.totalorder (!%p157_p3), %s958_s23, 0 }
  0x2f   : > { %160 = sbr.rel (%p157_p3) target bundleno = 764 (0x2fc), region = 32  ;;  %s532_s9 = sshll.u32 (!%p157_p3), %s843_s5, 6 }
  0x30   : > { %s163_s10 = scalar_lea.sflag (!%p157_p3), [#allocation3], %s843_s5  ;;  %s166_s11 = scalar_lea.vmem (!%p157_p3), [#allocation2], %s532_s9 }
  0x34   : > { %695 = dma.done.wait (%p962_p6), %s163_s10, 1024  }
  0x35   : > { %697 = vsyncadd (%p962_p6), %s163_s10, 4294966272  ;;  %v853_v0 = vld [vmem:[%s166_s11] sm:$0xff]  ;;  %v855_v1 = vld [vmem:[%s166_s11 + $0x8] sm:$0xff]  ;;  %v721_v12 = vmov 0.0   ;;  %vm722_vm0 = vmmov 0   ;;  %v217_v17 = vlaneseq  ;;  %vm228_vm1 = vcmask 130112  }
  0x36   : > { %v857_v2 = vld [vmem:[%s166_s11 + $0x20] sm:$0xff]  ;;  %v197_v3 = vadd.f32 %v855_v1, %v853_v0  ;;  %v861_v4 = vld [vmem:[%s166_s11 + $0x28] sm:$0xff]  ;;  %v863_v5 = vld [vmem:[%s166_s11 + $0x10] sm:$0xff]  ;;  %552 = vmatprep.subr.mxu0 %v721_v12  ;;  %563 = vmatprep.subr.mxu1 %v721_v12  ;;  %vm235_vm2 = vcmask 195712   ;;  %vm242_vm3 = vcmask 261312   ;;  %vm244_vm4 = vcmask 261120  }
  0x37   : > { %v865_v6 = vld [vmem:[%s166_s11 + $0x18] sm:$0xff]  ;;  %v203_v7 = vadd.f32 %v861_v4, %v857_v2  ;;  %v869_v8 = vld [vmem:[%s166_s11 + $0x30] sm:$0xff]  ;;  %v210_v15 = vld [vmem:[%s952_s1 + $0x8] sm:$0xff]  ;;  %560 = vmatprep.mubr.msk.f32.mxu0 %vm722_vm0, %v721_v12  ;;  %565 = vmatprep.mubr.msk.f32.mxu1 %vm722_vm0, %v721_v12  ;;  %v218_v18 = vand.u32 127, %v217_v17  ;;  %v220_v19 = vshrl.u32 %v217_v17, 7  ;;  %vm323_vm5 = vcmask 1041408  }
  0x38   : > { %v871_v9 = vld [vmem:[%s166_s11 + $0x38] sm:$0xff]  ;;  %198 = vadd.xlane.f32.xlu0 %v197_v3  ;;  %v200_v10 = vadd.f32 %v865_v6, %v863_v5  ;;  %v211_v14 = vld [vmem:[%s952_s1 + $0x10] sm:$0xff]  ;;  %v209_v16 = vld [vmem:[%s952_s1] sm:$0xff]  ;;  %vm319_vm6 = vcmask 15360   ;;  %s188_s27 = scalar_lea.vmem [#allocation5], %s532_s9  ;;  %s544_s29 = sshll.u32 %s767_s16, 10 }
  0x39   : > { %204 = vadd.xlane.f32.xlu1 %v203_v7  ;;  %v206_v11 = vadd.f32 %v871_v9, %v869_v8  ;;  %v212_v13 = vld [vmem:[%s952_s1 + $0x18] sm:$0xff]  ;;  %v223_v20 = vadd.s32 4294967288, %v218_v18  ;;  %v230_v21 = vadd.s32 4294967280, %v218_v18  ;;  %v237_v22 = vadd.s32 4294967272, %v218_v18  ;;  %v318_v38 = vld [vmem:[%s953_s2] sm:$0x3]  ;;  %s906_s10 = scalar_lea.hbm %s954_s3, %s544_s29 }
  0x3a   : > { %553 = vmatpush3.msra.mxu0 %v212_v13  ;;  %v221_v24 = vsub.s32 %v218_v18, %v220_v19  ;;  %564 = vmatpush3.msk.msra.mxu1 %vm323_vm5, %v318_v38  ;;  %v405_v47 = vsub.s32 0, %v220_v19  ;;  %s452_s28 = sshll.u32 %s188_s27, 4  ;;  %s439_s16 = scalar_lea.sflag [#allocation4], %s843_s5  ;;  %s901_s28 = int_to_ptr.vmem [resolvable:$true] %s452_s28 }
  0x3b   : > { %554 = vmatprep.subr.mxu0 %v721_v12  ;;  %v226_v26 = vsub.s32 %v223_v20, %v220_v19  ;;  %v233_v27 = vsub.s32 %v230_v21, %v220_v19  ;;  %v240_v28 = vsub.s32 %v237_v22, %v220_v19  ;;  %s652_s11 = scalar_lea.vmem %s901_s28, 1024  ;;  %p963_p12 = scmp.ne.s32.totalorder %s959_s24, 0 }
  0x3c   : > { %201 = vadd.xlane.f32.xlu0 %v200_v10  ;;  %555 = vmatpush3.msra.mxu0 %v211_v14  ;;  %p653_p11 = scmp.ne.s32.totalorder %s901_s28, %s652_s11  ;;  %s723_s23 = smov [#allocation5]  }
  0x3d   : > { %207 = vadd.xlane.f32.xlu1 %v206_v11  ;;  %556 = vmatprep.subr.mxu0 %v721_v12  ;;  %s656_s4 = sshll.u32 %s723_s23, 4  ;;  %s657_s4 = int_to_ptr.vmem [resolvable:$false] %s656_s4 }
  0x3e   : > { %557 = vmatpush3.msra.mxu0 %v210_v15  ;;  %p654_p13 = pnand %p653_p11, %p963_p12  ;;  %s658_s6 = scalar_lea.vmem %s657_s4, 2048 }
  0x3f   : > { %558 = vmatprep.subr.mxu0 %v721_v12  ;;  %p659_p5 = scmp.lt.s32.totalorder %s901_s28, %s657_s4  ;;  %p660_p7 = scmp.lt.s32.totalorder %s658_s6, %s652_s11 }
  0x40   : > { %559 = vmatpush3.msra.mxu0 %v209_v16  ;;  %p655_p4 = pneg %p654_p13 }
  0x41   : > { %p661_p8 = por %p660_p7, %p659_p5 }
  0x43   : > { %p662_p10 = pnand %p661_p8, %p655_p4 }
  0xc1   : > { %v199_v23 = vpop.xlane.xlu0 %198 }
  0xc2   : > { %v205_v25 = vpop.xlane.xlu1 %204  ;;  %v222_v30 = vrot.slane %v199_v23, %v221_v24 }
  0xc3   : > { %v234_v33 = vrot.slane %v205_v25, %v233_v27 }
  0xc5   : > { %v202_v29 = vpop.xlane.xlu0 %201 }
  0xc6   : > { %v227_v31 = vrot.slane %v202_v29, %v226_v26  ;;  %v208_v32 = vpop.xlane.xlu1 %207 }
  0xc7   : > { %v241_v34 = vrot.slane %v208_v32, %v240_v28 }
  0xc8   : > { %v229_v35 = vsel %vm228_vm1, %v227_v31, %v222_v30 }
  0xc9   : > { %v236_v36 = vsel %vm235_vm2, %v234_v33, %v229_v35 }
  0xca   : > { %v243_v37 = vsel %vm242_vm3, %v241_v34, %v236_v36 }
  0xcb   : > { %561 = vmatmul.mubr.msk.f32.vlgmr.msra.gmra.mxu0 %vm244_vm4, %v243_v37 }
 0x18b   : > { %v313_v39 = vpop.f32.mrf.mxu0 }
 0x18c   : > { %v317_v40 = vmax.f32 %v313_v39, 0.0 }
 0x18d   : > { %v562_v41 = vpop.f32.mrf.mxu0 }
 0x18e   : > { %566 = vmatmul.mubr.msk.f32.vlgmr.msra.gmra.mxu1 %vm319_vm6, %v317_v40 }
 0x24e   : > { %v393_v42 = vpop.f32.mrf.mxu1 }
 0x24f   : > { %v537_v43 = vmul.f32 -1.442695, %v393_v42 }
 0x250   : > { %v567_v44 = vpop.f32.mrf.mxu1 }
 0x251   : > { %620 = vpow2.f32 %v537_v43 }
 0x25e   : > { %v621_v45 = vpop.eup %620 }
 0x25f   : > { %v400_v46 = vadd.f32 1.0, %v621_v45 }
 0x261   : > { %622 = vrcp.f32 %v400_v46 }
 0x26e   : > { %v623_v48 = vpop.eup %622 }
 0x26f   : > { %v406_v49 = vrot.slane %v623_v48, %v405_v47 }
 0x271   : > { %412 = vbcast.lane.b32.xlu1 %v406_v49, 264  ;;  %408 = vbcast.lane.b32.xlu0 %v406_v49, 256 }
 0x275   : > { %416 = vbcast.lane.b32.xlu1 %v406_v49, 272 }
 0x279   : > { %420 = vbcast.lane.b32.xlu1 %v406_v49, 280 }
 0x2e3   : > { %v413_v50 = vpop.permute.xlu1 %412  ;;  %v409_v51 = vpop.permute.xlu0 %408 }
 0x2e4   : > { %v424_v52 = vmul.f32 %v413_v50, %v863_v5  ;;  %v425_v53 = vmul.f32 %v413_v50, %v865_v6  ;;  %v422_v54 = vmul.f32 %v409_v51, %v853_v0  ;;  %v423_v55 = vmul.f32 %v409_v51, %v855_v1 }
 0x2e6   : > { %432 = vst [vmem:[%s188_s27 + $0x10] sm:$0xff] %v424_v52  ;;  %433 = vst [vmem:[%s188_s27 + $0x18] sm:$0xff] %v425_v53 }
 0x2e7   : > { %430 = vst [vmem:[%s188_s27] sm:$0xff] %v422_v54  ;;  %431 = vst [vmem:[%s188_s27 + $0x8] sm:$0xff] %v423_v55  ;;  %v417_v56 = vpop.permute.xlu1 %416 }
 0x2e8   : > { %v426_v57 = vmul.f32 %v417_v56, %v857_v2  ;;  %v427_v58 = vmul.f32 %v417_v56, %v861_v4 }
 0x2ea   : > { %434 = vst [vmem:[%s188_s27 + $0x20] sm:$0xff] %v426_v57  ;;  %435 = vst [vmem:[%s188_s27 + $0x28] sm:$0xff] %v427_v58 }
 0x2eb   : > { %v421_v59 = vpop.permute.xlu1 %420 }
 0x2ec   : > { %v428_v60 = vmul.f32 %v421_v59, %v869_v8  ;;  %v429_v61 = vmul.f32 %v421_v59, %v871_v9 }
 0x2ee   : > { %436 = vst [vmem:[%s188_s27 + $0x30] sm:$0xff] %v428_v60  ;;  %437 = vst [vmem:[%s188_s27 + $0x38] sm:$0xff] %v429_v61 }
 0x2ef   : > { %665 = shalt.err (!%p662_p10)
}
 0x2f0   : > { %s666_s7 = scalar_lea.hbm %s906_s10, 1024  ;;  %s670_s19 = scalar_lea.hbm %s954_s3, 2048 }
 0x2f1   : > { %p667_p0 = scmp.ne.s32.totalorder %s906_s10, %s666_s7  ;;  %p671_p1 = scmp.lt.s32.totalorder %s906_s10, %s954_s3 }
 0x2f2   : > { %p672_p3 = scmp.lt.s32.totalorder %s670_s19, %s666_s7 }
 0x2f3   : > { %p668_p2 = pnand %p667_p0, %p963_p12 }
 0x2f4   : > { %p673_p6 = por %p672_p3, %p671_p1 }
 0x2f5   : > { %p669_p9 = pneg %p668_p2 }
 0x2f7   : > { %p674_p11 = pnand %p673_p6, %p669_p9 }
 0x2f9   : > { %677 = shalt.err (!%p674_p11)
}
 0x2fa   : > { %s724_s26 = smov 256   ;;  %s725_s27 = smov 16  }
 0x2fb   : > { %570 = dma.vmem_to_hbm [thread:$0]  (%p963_p12), %s901_s28, 1024, %s906_s10, %s439_s16, %s724_s26, %s724_s26, %s725_s27  }
 0x2fc PF: > { %s467_s29 = sand.u32 1, %s704_s12   ;;  %p964_p13 = scmp.ne.s32.totalorder %s960_s25, 0 }
 0x2fd   : > { %p965_p4 = scmp.ge.s32.totalorder %s716_s15, 2  ;;  %s468_s30 = scalar_lea.sflag [#allocation4], %s467_s29 }
 0x2ff   : > { %p577_p5 = pnand %p965_p4, %p964_p13 }
 0x301   : > { %p578_p7 = pneg %p577_p5 }
 0x303   : > { %699 = dma.done.wait (%p578_p7), %s468_s30, 1024  }
 0x304   : > { %701 = vsyncadd (%p578_p7), %s468_s30, 4294966272  ;;  %p16_p8 = scmp.ge.s32.totalorder %s771_s18, 4   ;;  %s966_s12 = smov %s708_s13 }
 0x305   : > { %s967_s13 = smov %s712_s14  ;;  %s968_s14 = smov %s783_s21 }
 0x306   : > { %s969_s15 = smov %s771_s18  ;;  %18 = sbr.rel (!%p16_p8) target bundleno = 5 (0x5), region = 77 }
 0x30b   :  { %473 = vsyncpa [#allocation3], 1 }
 0x30c   :  { %475 = vsyncpa [#allocation3 + $0x1], 1 }
 0x30d   :  { %476 = vsyncpa [#allocation4], 1 }
 0x30e   :  { %478 = vsyncpa [#allocation4 + $0x1], 1 }

</bundles_post_ra>
